<compile_context>
chip_gen: v7x
topology: tpu7x:2x2x1
jax: 0.10.0
libtpu: 0.0.40
codegen_flags: <defaults>
</compile_context>

<pallas_src>
from functools import partial

import jax
import jax.numpy as jnp
from jax import lax
from jax.experimental import pallas as pl
from jax.experimental.pallas import tpu as pltpu


def _preact_block_kernel(x_ref, w1_ref, w2_ref, s1_ref, b1_ref, b2_ref, o_ref):
    """One block of `block_n` batch images per grid step.

    x_ref : (block_n, H, W*C)   VMEM, f32 (NHWC with W and C flattened)
    w*_ref: (3*W*C, W*C)        VMEM, bf16 stacked block-Toeplitz conv weights
                                (rows ordered [dy=0 | dy=1 | dy=2])
    s1/b1 : (1, W*C)            VMEM, f32 folded-BN1 scale / shift
    b2    : (1, W*C)            VMEM, f32 folded-BN2 shift (scale folded in w1)
    o_ref : (block_n, H, W*C)   VMEM, f32
    """
    nb, h_img, wc = x_ref.shape
    m = nb * h_img
    x = x_ref[...].reshape(m, wc)                       # leading-dim merge: layout-free
    row = lax.broadcasted_iota(jnp.int32, (m, wc), 0)
    is_top = (row % h_img) == 0
    is_bot = (row % h_img) == (h_img - 1)

    def conv3x3(a, w_ref):
        # a: (m, W*Cin) f32.  Row shifts (dy taps) via XLU sublane rolls +
        # per-image edge masks; dx taps + channel contraction live inside the
        # stacked block-Toeplitz weights -> single MXU matmul with K = 3*W*C.
        up = jnp.where(is_top, 0.0, pltpu.roll(a, 1, axis=0))       # a[h-1]
        dn = jnp.where(is_bot, 0.0, pltpu.roll(a, m - 1, axis=0))   # a[h+1]
        taps = jnp.concatenate(
            [up.astype(jnp.bfloat16),
             a.astype(jnp.bfloat16),
             dn.astype(jnp.bfloat16)], axis=-1)                      # (m, 3*W*C) bf16
        return jnp.dot(taps, w_ref[...],
                       preferred_element_type=jnp.float32)           # (m, W*Cout) f32

    # BN1 (inference affine) + ReLU, conv1 (conv1 weights carry BN2's scale)
    h1 = jnp.maximum(x * s1_ref[...] + b1_ref[...], 0.0)
    y1 = conv3x3(h1, w1_ref)
    # BN2 shift + ReLU, conv2
    h2 = jnp.maximum(y1 + b2_ref[...], 0.0)
    y2 = conv3x3(h2, w2_ref)
    # identity residual (subsample=False)
    o_ref[...] = (y2 + x).reshape(nb, h_img, wc).astype(o_ref.dtype)


@partial(jax.jit, static_argnames=("block_n",))
def preact_resnet_block(x_flat, w1_t, w2_t, s1, b1, b2, block_n=1):
    N, H, WC = x_flat.shape
    assert N % block_n == 0
    grid_spec = pltpu.PrefetchScalarGridSpec(
        num_scalar_prefetch=0,
        grid=(N // block_n,),
        in_specs=[
            pl.BlockSpec((block_n, H, WC), lambda n: (n, 0, 0)),
            pl.BlockSpec(w1_t.shape, lambda n: (0, 0)),
            pl.BlockSpec(w2_t.shape, lambda n: (0, 0)),
            pl.BlockSpec((1, WC), lambda n: (0, 0)),
            pl.BlockSpec((1, WC), lambda n: (0, 0)),
            pl.BlockSpec((1, WC), lambda n: (0, 0)),
        ],
        out_specs=pl.BlockSpec((block_n, H, WC), lambda n: (n, 0, 0)),
    )
    return pl.pallas_call(
        _preact_block_kernel,
        out_shape=jax.ShapeDtypeStruct((N, H, WC), jnp.float32),
        grid_spec=grid_spec,
        compiler_params=pltpu.CompilerParams(
            dimension_semantics=("parallel",)),
    )(x_flat, w1_t, w2_t, s1, b1, b2)


def _toeplitz_conv_weights(w_hwio, width):
    """(3, 3, Ci, Co) HWIO -> (3*width*Ci, width*Co) stacked block-Toeplitz.

    T[dy, wp*Ci+ci, w*Co+co] = w_hwio[dy, wp-w+1, ci, co] if 0 <= wp-w+1 <= 2
    else 0, so  concat_dy(rowshift_dy(act)) @ stack_dy(T[dy])  == 3x3 SAME
    conv, stride 1.  Pure weight re-layout (wrapper glue), done once.
    """
    kh, kw, ci, co = w_hwio.shape
    wp = jnp.arange(width)[:, None]
    wq = jnp.arange(width)[None, :]
    dx = wp - wq + 1                                    # (W, W)
    valid = (dx >= 0) & (dx <= kw - 1)
    g = w_hwio[:, jnp.clip(dx, 0, kw - 1), :, :]        # (3, W, W, Ci, Co)
    g = jnp.where(valid[None, :, :, None, None], g, 0)
    t = jnp.transpose(g, (0, 1, 3, 2, 4)).reshape(kh, width * ci, width * co)
    return t.reshape(kh * width * ci, width * co)       # rows: [dy=0 | dy=1 | dy=2]


def _reference_nhwc(x, w1_hwio, w2_hwio, s1, b1, s2, b2):
    """Pure-JAX reference (lax conv) with the same bf16 MXU quantization."""
    dn = ('NHWC', 'HWIO', 'NHWC')
    h = jnp.maximum(x * s1 + b1, 0.0).astype(jnp.bfloat16)
    h = lax.conv_general_dilated(h, w1_hwio, (1, 1), 'SAME',
                                 dimension_numbers=dn,
                                 preferred_element_type=jnp.float32)
    h = jnp.maximum(h * s2 + b2, 0.0).astype(jnp.bfloat16)
    z = lax.conv_general_dilated(h, w2_hwio, (1, 1), 'SAME',
                                 dimension_numbers=dn,
                                 preferred_element_type=jnp.float32)
    return z + x


if __name__ == "__main__":
    # Small shapes consistent with the module: N=2, C_in=C_out=4, H=W=16.
    N, C, H, W = 2, 4, 16, 16
    eps = 1e-5

    key = jax.random.PRNGKey(0)
    keys = jax.random.split(key, 10)

    # PyTorch-convention input: NCHW.
    x_nchw = jax.random.normal(keys[0], (N, C, H, W), jnp.float32)

    # Conv weights in PyTorch OIHW convention (Cout, Cin, 3, 3), no bias.
    w1_oihw = jax.random.normal(keys[1], (C, C, 3, 3), jnp.float32) * 0.1
    w2_oihw = jax.random.normal(keys[2], (C, C, 3, 3), jnp.float32) * 0.1

    # BatchNorm parameters (eval-mode running stats).
    gamma1 = 1.0 + 0.1 * jax.random.normal(keys[3], (C,), jnp.float32)
    beta1 = 0.1 * jax.random.normal(keys[4], (C,), jnp.float32)
    mean1 = 0.1 * jax.random.normal(keys[5], (C,), jnp.float32)
    var1 = jnp.abs(jax.random.normal(keys[6], (C,), jnp.float32)) + 0.5
    gamma2 = 1.0 + 0.1 * jax.random.normal(keys[7], (C,), jnp.float32)
    beta2 = 0.1 * jax.random.normal(keys[8], (C,), jnp.float32)
    mean2 = 0.1 * jax.random.normal(keys[9], (C,), jnp.float32)
    var2 = jnp.ones((C,), jnp.float32)

    # Fold BN (eval mode) into per-channel scale/shift (glue, plain JAX).
    s1 = gamma1 / jnp.sqrt(var1 + eps)
    b1 = beta1 - mean1 * s1
    s2 = gamma2 / jnp.sqrt(var2 + eps)
    b2 = beta2 - mean2 * s2

    # Layout glue: NCHW -> NHWC -> lane-dense (N, H, W*C).
    x_nhwc = jnp.transpose(x_nchw, (0, 2, 3, 1))
    x_flat = x_nhwc.reshape(N, H, W * C)

    # OIHW -> HWIO.  Fold BN2's scale into conv1's output channels, cast to
    # bf16 (MXU operands), then fold dx taps + channel contraction into the
    # stacked block-Toeplitz form (all done once in the wrapper).
    w1_hwio_f32 = jnp.transpose(w1_oihw, (2, 3, 1, 0))
    w2_hwio_f32 = jnp.transpose(w2_oihw, (2, 3, 1, 0))
    w1_hwio = w1_hwio_f32.astype(jnp.bfloat16)          # for the reference
    w2_hwio = w2_hwio_f32.astype(jnp.bfloat16)
    w1_fold = (w1_hwio_f32 * s2[None, None, None, :]).astype(jnp.bfloat16)
    w1_t = _toeplitz_conv_weights(w1_fold, W)            # (3*W*C, W*C)
    w2_t = _toeplitz_conv_weights(w2_hwio, W)            # (3*W*C, W*C)

    # Folded-BN scale/shift tiled over the flattened W*C lane axis.
    s1_l = jnp.tile(s1, W).reshape(1, W * C)
    b1_l = jnp.tile(b1, W).reshape(1, W * C)
    b2_l = jnp.tile(b2, W).reshape(1, W * C)

    # Batch-blocking: merge images into the matmul M dimension (target ~128).
    block_n = max(1, min(N, 128 // H))
    while N % block_n:
        block_n -= 1

    out_flat = preact_resnet_block(x_flat, w1_t, w2_t, s1_l, b1_l, b2_l,
                                   block_n=block_n)
    out_flat = jax.block_until_ready(out_flat)
    out = out_flat.reshape(N, H, W, C)

    ref = _reference_nhwc(x_nhwc, w1_hwio, w2_hwio, s1, b1, s2, b2)
    assert out.shape == (N, H, W, C)
    # bf16 MXU operands (f32 accumulation) in both kernel and reference;
    # tolerance covers summation-order / bf16 rounding (incl. the s2 fold
    # happening before vs. after bf16 quantization) only.
    assert jnp.allclose(out, ref, atol=2e-2, rtol=2e-2), "mismatch vs reference"

    print("KERNEL_OK")
</pallas_src>

<mosaic_0001>
module attributes {stable_mosaic.version = 11 : i64} {
  func.func @_preact_block_kernel(%arg0: i32, %arg1: memref<2x16x64xf32, #tpu.memory_space<vmem>>, %arg2: memref<192x64xbf16, #tpu.memory_space<vmem>>, %arg3: memref<192x64xbf16, #tpu.memory_space<vmem>>, %arg4: memref<1x64xf32, #tpu.memory_space<vmem>>, %arg5: memref<1x64xf32, #tpu.memory_space<vmem>>, %arg6: memref<1x64xf32, #tpu.memory_space<vmem>>, %arg7: memref<2x16x64xf32, #tpu.memory_space<vmem>>) attributes {dimension_semantics = [#tpu.dimension_semantics<parallel>], iteration_bounds = array<i64: 1>, scalar_prefetch = 0 : i64, scratch_operands = 0 : i64, tpu.core_type = #tpu.core_type<tc>, window_params = [{transform_indices = @transform_0, window_bounds = array<i64: 2, 16, 64>}, {pipeline_mode = #tpu.pipeline_mode<synchronous>, transform_indices = @transform_1, window_bounds = array<i64: 192, 64>}, {pipeline_mode = #tpu.pipeline_mode<synchronous>, transform_indices = @transform_2, window_bounds = array<i64: 192, 64>}, {pipeline_mode = #tpu.pipeline_mode<synchronous>, transform_indices = @transform_3, window_bounds = array<i64: 1, 64>}, {pipeline_mode = #tpu.pipeline_mode<synchronous>, transform_indices = @transform_4, window_bounds = array<i64: 1, 64>}, {pipeline_mode = #tpu.pipeline_mode<synchronous>, transform_indices = @transform_5, window_bounds = array<i64: 1, 64>}, {transform_indices = @transform_6, window_bounds = array<i64: 2, 16, 64>}]} {
    %c0 = arith.constant 0 : index
    %c0_0 = arith.constant 0 : index
    %c0_1 = arith.constant 0 : index
    %0 = vector.load %arg1[%c0, %c0_0, %c0_1] : memref<2x16x64xf32, #tpu.memory_space<vmem>>, vector<2x16x64xf32>
    %1 = vector.shape_cast %0 : vector<2x16x64xf32> to vector<32x64xf32>
    %2 = tpu.iota {dimensions = array<i32: 0>} : vector<32x64xi32>
    %c16_i32 = arith.constant 16 : i32
    %c0_i32 = arith.constant 0 : i32
    %3 = arith.cmpi eq, %c16_i32, %c0_i32 : i32
    %c1_i32 = arith.constant 1 : i32
    %4 = arith.select %3, %c1_i32, %c16_i32 : i32
    %5 = vector.broadcast %4 : i32 to vector<32x64xi32>
    %6 = arith.remsi %2, %5 : vector<32x64xi32>
    %c0_i32_2 = arith.constant 0 : i32
    %7 = vector.broadcast %c0_i32_2 : i32 to vector<32x64xi32>
    %8 = arith.cmpi ne, %6, %7 : vector<32x64xi32>
    %c0_i32_3 = arith.constant 0 : i32
    %9 = vector.broadcast %c0_i32_3 : i32 to vector<32x64xi32>
    %10 = arith.cmpi slt, %6, %9 : vector<32x64xi32>
    %c0_i32_4 = arith.constant 0 : i32
    %11 = arith.cmpi slt, %4, %c0_i32_4 : i32
    %12 = vector.broadcast %11 : i1 to vector<32x64xi1>
    %13 = vector.broadcast %12 : vector<32x64xi1> to vector<32x64xi1>
    %14 = arith.xori %10, %13 : vector<32x64xi1>
    %15 = arith.andi %14, %8 : vector<32x64xi1>
    %16 = vector.broadcast %4 : i32 to vector<32x64xi32>
    %17 = arith.addi %6, %16 : vector<32x64xi32>
    %18 = arith.select %15, %17, %6 : vector<32x64xi1>, vector<32x64xi32>
    %c0_i32_5 = arith.constant 0 : i32
    %19 = vector.broadcast %c0_i32_5 : i32 to vector<32x64xi32>
    %20 = arith.cmpi eq, %18, %19 : vector<32x64xi32>
    %c16_i32_6 = arith.constant 16 : i32
    %c0_i32_7 = arith.constant 0 : i32
    %21 = arith.cmpi eq, %c16_i32_6, %c0_i32_7 : i32
    %c1_i32_8 = arith.constant 1 : i32
    %22 = arith.select %21, %c1_i32_8, %c16_i32_6 : i32
    %23 = vector.broadcast %22 : i32 to vector<32x64xi32>
    %24 = arith.remsi %2, %23 : vector<32x64xi32>
    %c0_i32_9 = arith.constant 0 : i32
    %25 = vector.broadcast %c0_i32_9 : i32 to vector<32x64xi32>
    %26 = arith.cmpi ne, %24, %25 : vector<32x64xi32>
    %c0_i32_10 = arith.constant 0 : i32
    %27 = vector.broadcast %c0_i32_10 : i32 to vector<32x64xi32>
    %28 = arith.cmpi slt, %24, %27 : vector<32x64xi32>
    %c0_i32_11 = arith.constant 0 : i32
    %29 = arith.cmpi slt, %22, %c0_i32_11 : i32
    %30 = vector.broadcast %29 : i1 to vector<32x64xi1>
    %31 = vector.broadcast %30 : vector<32x64xi1> to vector<32x64xi1>
    %32 = arith.xori %28, %31 : vector<32x64xi1>
    %33 = arith.andi %32, %26 : vector<32x64xi1>
    %34 = vector.broadcast %22 : i32 to vector<32x64xi32>
    %35 = arith.addi %24, %34 : vector<32x64xi32>
    %36 = arith.select %33, %35, %24 : vector<32x64xi1>, vector<32x64xi32>
    %c15_i32 = arith.constant 15 : i32
    %37 = vector.broadcast %c15_i32 : i32 to vector<32x64xi32>
    %38 = arith.cmpi eq, %36, %37 : vector<32x64xi32>
    %c0_12 = arith.constant 0 : index
    %c0_13 = arith.constant 0 : index
    %39 = vector.load %arg4[%c0_12, %c0_13] : memref<1x64xf32, #tpu.memory_space<vmem>>, vector<1x64xf32>
    %40 = vector.broadcast %39 : vector<1x64xf32> to vector<32x64xf32>
    %41 = arith.mulf %1, %40 : vector<32x64xf32>
    %c0_14 = arith.constant 0 : index
    %c0_15 = arith.constant 0 : index
    %42 = vector.load %arg5[%c0_14, %c0_15] : memref<1x64xf32, #tpu.memory_space<vmem>>, vector<1x64xf32>
    %43 = vector.broadcast %42 : vector<1x64xf32> to vector<32x64xf32>
    %44 = arith.addf %41, %43 : vector<32x64xf32>
    %cst = arith.constant 0.000000e+00 : f32
    %45 = vector.broadcast %cst : f32 to vector<32x64xf32>
    %46 = arith.maximumf %44, %45 : vector<32x64xf32>
    %c1_i32_16 = arith.constant 1 : i32
    %47 = tpu.dynamic_rotate %46 by %c1_i32_16 dim 0 : vector<32x64xf32>, i32 -> vector<32x64xf32>
    %cst_17 = arith.constant 0.000000e+00 : f32
    %48 = vector.broadcast %cst_17 : f32 to vector<32x64xf32>
    %49 = arith.select %20, %48, %47 : vector<32x64xi1>, vector<32x64xf32>
    %c31_i32 = arith.constant 31 : i32
    %50 = tpu.dynamic_rotate %46 by %c31_i32 dim 0 : vector<32x64xf32>, i32 -> vector<32x64xf32>
    %cst_18 = arith.constant 0.000000e+00 : f32
    %51 = vector.broadcast %cst_18 : f32 to vector<32x64xf32>
    %52 = arith.select %38, %51, %50 : vector<32x64xi1>, vector<32x64xf32>
    %53 = arith.truncf %49 : vector<32x64xf32> to vector<32x64xbf16>
    %54 = arith.truncf %46 : vector<32x64xf32> to vector<32x64xbf16>
    %55 = arith.truncf %52 : vector<32x64xf32> to vector<32x64xbf16>
    %56 = tpu.concatenate %53, %54, %55 in 1 : vector<32x64xbf16>, vector<32x64xbf16>, vector<32x64xbf16> -> vector<32x192xbf16>
    %c0_19 = arith.constant 0 : index
    %c0_20 = arith.constant 0 : index
    %57 = vector.load %arg2[%c0_19, %c0_20] : memref<192x64xbf16, #tpu.memory_space<vmem>>, vector<192x64xbf16>
    %cst_21 = arith.constant dense<0.000000e+00> : vector<32x64xf32>
    %58 = tpu.matmul %56, %57, %cst_21 {dimension_numbers = #tpu.dot_dimension_numbers<[1], [0], [0], [1], [0, 0, 1, 1], [], []>} : vector<32x192xbf16>, vector<192x64xbf16>, vector<32x64xf32> -> vector<32x64xf32>
    %c0_22 = arith.constant 0 : index
    %c0_23 = arith.constant 0 : index
    %59 = vector.load %arg6[%c0_22, %c0_23] : memref<1x64xf32, #tpu.memory_space<vmem>>, vector<1x64xf32>
    %60 = vector.broadcast %59 : vector<1x64xf32> to vector<32x64xf32>
    %61 = arith.addf %58, %60 : vector<32x64xf32>
    %cst_24 = arith.constant 0.000000e+00 : f32
    %62 = vector.broadcast %cst_24 : f32 to vector<32x64xf32>
    %63 = arith.maximumf %61, %62 : vector<32x64xf32>
    %c1_i32_25 = arith.constant 1 : i32
    %64 = tpu.dynamic_rotate %63 by %c1_i32_25 dim 0 : vector<32x64xf32>, i32 -> vector<32x64xf32>
    %cst_26 = arith.constant 0.000000e+00 : f32
    %65 = vector.broadcast %cst_26 : f32 to vector<32x64xf32>
    %66 = arith.select %20, %65, %64 : vector<32x64xi1>, vector<32x64xf32>
    %c31_i32_27 = arith.constant 31 : i32
    %67 = tpu.dynamic_rotate %63 by %c31_i32_27 dim 0 : vector<32x64xf32>, i32 -> vector<32x64xf32>
    %cst_28 = arith.constant 0.000000e+00 : f32
    %68 = vector.broadcast %cst_28 : f32 to vector<32x64xf32>
    %69 = arith.select %38, %68, %67 : vector<32x64xi1>, vector<32x64xf32>
    %70 = arith.truncf %66 : vector<32x64xf32> to vector<32x64xbf16>
    %71 = arith.truncf %63 : vector<32x64xf32> to vector<32x64xbf16>
    %72 = arith.truncf %69 : vector<32x64xf32> to vector<32x64xbf16>
    %73 = tpu.concatenate %70, %71, %72 in 1 : vector<32x64xbf16>, vector<32x64xbf16>, vector<32x64xbf16> -> vector<32x192xbf16>
    %c0_29 = arith.constant 0 : index
    %c0_30 = arith.constant 0 : index
    %74 = vector.load %arg3[%c0_29, %c0_30] : memref<192x64xbf16, #tpu.memory_space<vmem>>, vector<192x64xbf16>
    %cst_31 = arith.constant dense<0.000000e+00> : vector<32x64xf32>
    %75 = tpu.matmul %73, %74, %cst_31 {dimension_numbers = #tpu.dot_dimension_numbers<[1], [0], [0], [1], [0, 0, 1, 1], [], []>} : vector<32x192xbf16>, vector<192x64xbf16>, vector<32x64xf32> -> vector<32x64xf32>
    %76 = arith.addf %75, %1 : vector<32x64xf32>
    %77 = vector.shape_cast %76 : vector<32x64xf32> to vector<2x16x64xf32>
    %c0_32 = arith.constant 0 : index
    %c0_33 = arith.constant 0 : index
    %c0_34 = arith.constant 0 : index
    %78 = vector.load %arg7[%c0_32, %c0_33, %c0_34] : memref<2x16x64xf32, #tpu.memory_space<vmem>>, vector<2x16x64xf32>
    tpu.vector_store %arg7[%c0_32, %c0_33, %c0_34], %77 {strides = array<i32>} : memref<2x16x64xf32, #tpu.memory_space<vmem>>, vector<2x16x64xf32>,
    return
  }
  func.func @transform_0(%arg0: i32) -> (i32, i32, i32) {
    %c0_i32 = arith.constant 0 : i32
    %c0_i32_0 = arith.constant 0 : i32
    %c0_i32_1 = arith.constant 0 : i32
    return %arg0, %c0_i32, %c0_i32_0 : i32, i32, i32
  }
  func.func @transform_1(%arg0: i32) -> (i32, i32) {
    %c0_i32 = arith.constant 0 : i32
    %c0_i32_0 = arith.constant 0 : i32
    %c0_i32_1 = arith.constant 0 : i32
    return %c0_i32, %c0_i32_0 : i32, i32
  }
  func.func @transform_2(%arg0: i32) -> (i32, i32) {
    %c0_i32 = arith.constant 0 : i32
    %c0_i32_0 = arith.constant 0 : i32
    %c0_i32_1 = arith.constant 0 : i32
    return %c0_i32, %c0_i32_0 : i32, i32
  }
  func.func @transform_3(%arg0: i32) -> (i32, i32) {
    %c0_i32 = arith.constant 0 : i32
    %c0_i32_0 = arith.constant 0 : i32
    %c0_i32_1 = arith.constant 0 : i32
    return %c0_i32, %c0_i32_0 : i32, i32
  }
  func.func @transform_4(%arg0: i32) -> (i32, i32) {
    %c0_i32 = arith.constant 0 : i32
    %c0_i32_0 = arith.constant 0 : i32
    %c0_i32_1 = arith.constant 0 : i32
    return %c0_i32, %c0_i32_0 : i32, i32
  }
  func.func @transform_5(%arg0: i32) -> (i32, i32) {
    %c0_i32 = arith.constant 0 : i32
    %c0_i32_0 = arith.constant 0 : i32
    %c0_i32_1 = arith.constant 0 : i32
    return %c0_i32, %c0_i32_0 : i32, i32
  }
  func.func @transform_6(%arg0: i32) -> (i32, i32, i32) {
    %c0_i32 = arith.constant 0 : i32
    %c0_i32_0 = arith.constant 0 : i32
    %c0_i32_1 = arith.constant 0 : i32
    return %arg0, %c0_i32, %c0_i32_0 : i32, i32, i32
  }
}

</mosaic_0001>

<bundles_post_ra>
// kernel: preact_resnet_block.1
= control target key start
LH: loop header
LB: loop body
LE: loop exit
PB: predicated region body
PF: predicated region fallthrough
CT: control target
= control target key end

     0   :  { %v29_v3 = vlaneseq  ;;  %v624_v9 = vmov 0   ;;  %s625_s12 = smov 64   ;;  %vm154_vm2 = vcmask 523264   ;;  %s897_s0 = inlined_call_operand.vmem [shape: f32[2,16,64], index: 0, kind: input, shape index: {}]   ;;  %s898_s1 = inlined_call_operand.vmem [shape: bf16[192,64], index: 1, kind: input, shape index: {}]   ;;  %s899_s2 = inlined_call_operand.vmem [shape: bf16[192,64], index: 2, kind: input, shape index: {}]   ;;  %s900_s3 = inlined_call_operand.vmem [shape: f32[1,64], index: 3, kind: input, shape index: {}]   ;;  %s901_s4 = inlined_call_operand.vmem [shape: f32[1,64], index: 4, kind: input, shape index: {}]   ;;  %s902_s5 = inlined_call_operand.vmem [shape: f32[1,64], index: 5, kind: input, shape index: {}]   ;;  %s903_s6 = inlined_call_operand.hbm [shape: f32[2,16,64], index: 6, kind: output, shape index: {}]  }
   0x1   :  { %v667_v0 = vld [vmem:[%s897_s0] sm:$0xff]  ;;  %v672_v1 = vld [vmem:[%s897_s0 + $0x8] sm:$0xff]  ;;  %v685_v7 = vld [vmem:[%s897_s0 + $0x10] sm:$0xff]  ;;  %272 = vmatprep.subr.bf16.mxu0 %v624_v9  ;;  %471 = vmatprep.subr.bf16.mxu1 %v624_v9 }
   0x2   :  { %v540_v2 = vld [vmem:[%s900_s3] ss:$0 sm:$0xff]  ;;  %v690_v8 = vld [vmem:[%s897_s0 + $0x18] sm:$0xff]  ;;  %v699_v13 = vshrl.u32 %v29_v3, 7  ;;  %v577_v18 = vld [vmem:[%s898_s1 + $0x8] sm:$0xff]  }
   0x3   :  { %v97_v4 = vmul.f32 %v540_v2, %v667_v0  ;;  %v98_v5 = vmul.f32 %v540_v2, %v672_v1  ;;  %v541_v6 = vld [vmem:[%s901_s4] ss:$0 sm:$0xff]  ;;  %v99_v10 = vmul.f32 %v540_v2, %v685_v7  ;;  %v100_v11 = vmul.f32 %v540_v2, %v690_v8  ;;  %v578_v25 = vld [vmem:[%s898_s1 + $0x10] sm:$0xff]   ;;  %v579_v29 = vld [vmem:[%s898_s1 + $0x18] sm:$0xff]  }
   0x4   :  { %v576_v12 = vld [vmem:[%s898_s1] sm:$0xff]   ;;  %v31_v19 = vadd.s32 8, %v699_v13  ;;  %vm133_vm1 = vcmp.lt.s32.totalorder %v699_v13, 7  ;;  %v38_v37 = vand.u32 15, %v699_v13  ;;  %vm120_vm3 = vcmp.lt.s32.totalorder %v699_v13, 1  ;;  %v581_v54 = vld [vmem:[%s898_s1 + $0x28] sm:$0xff]  }
   0x5   :  { %v108_v14 = vadd.f32 %v541_v6, %v97_v4  ;;  %v109_v15 = vadd.f32 %v541_v6, %v98_v5  ;;  %v110_v16 = vadd.f32 %v541_v6, %v99_v10  ;;  %v111_v17 = vadd.f32 %v541_v6, %v100_v11  ;;  %273 = vmatpush1.bf16.msra.mxu0 %v576_v12  ;;  %v580_v42 = vld [vmem:[%s898_s1 + $0x20] sm:$0xff]   ;;  %v582_v62 = vld [vmem:[%s898_s1 + $0x30] sm:$0xff]  }
   0x6   :  { %274 = vmatprep.subr.bf16.mxu0 %v624_v9  ;;  %v45_v26 = vand.u32 15, %v31_v19  ;;  %v33_v40 = vadd.s32 24, %v699_v13  ;;  %vm733_vm4 = vcmp.eq.s32.totalorder %v38_v37, 0  ;;  %v32_v52 = vadd.s32 16, %v699_v13 }
   0x7   :  { %v112_v20 = vmax.f32 %v108_v14, 0.0  ;;  %v113_v21 = vmax.f32 %v109_v15, 0.0  ;;  %v114_v22 = vmax.f32 %v110_v16, 0.0  ;;  %v115_v23 = vmax.f32 %v111_v17, 0.0 }
   0x8   :  { %vm714_vm0 = vcmp.eq.s32.totalorder %v45_v26, 15  ;;  %v59_v48 = vand.u32 15, %v33_v40  ;;  %v52_v57 = vand.u32 15, %v32_v52 }
   0x9   :  { %v144_v24 = vpack.c.bf16 %v113_v21, %v112_v20  ;;  %275 = vmatpush1.bf16.msra.mxu0 %v577_v18  ;;  %v145_v27 = vpack.c.bf16 %v115_v23, %v114_v22  ;;  %v117_v28 = vrot.slane %v113_v21, 7  ;;  %v129_v30 = vrot.slane %v112_v20, 1 }
   0xa   :  { %276 = vmatprep.subr.bf16.mxu0 %v624_v9  ;;  %v116_v31 = vrot.slane %v112_v20, 7  ;;  %v130_v32 = vrot.slane %v113_v21, 1  ;;  %v131_v34 = vrot.slane %v114_v22, 1  ;;  %v119_v38 = vrot.slane %v115_v23, 7 }
   0xb   :  { %150 = vrot.lane.b32.xlu0 %v144_v24, %s625_s12  ;;  %v132_v41 = vrot.slane %v115_v23, 1  ;;  %v118_v53 = vrot.slane %v114_v22, 7  ;;  %vm753_vm5 = vcmp.eq.s32.totalorder %v59_v48, 15  ;;  %vm764_vm6 = vcmp.eq.s32.totalorder %v52_v57, 0 }
   0xc   :  { %v135_v35 = vsel %vm133_vm1, %v130_v32, %v131_v34  ;;  %v136_v36 = vsel %vm133_vm1, %v129_v30, %v130_v32  ;;  %v123_v45 = vsel %vm120_vm3, %v116_v31, %v117_v28  ;;  %v124_v46 = vsel %vm120_vm3, %v119_v38, %v116_v31 }
   0xd   :  { %277 = vmatpush1.bf16.msra.mxu0 %v578_v25  ;;  %v139_v39 = vsel %vm714_vm0, 0.0, %v135_v35  ;;  %v125_v47 = vsel %vm733_vm4, 0.0, %v124_v46  ;;  %v134_v49 = vsel %vm133_vm1, %v131_v34, %v132_v41  ;;  %v137_v50 = vsel %vm133_vm1, %v132_v41, %v129_v30 }
   0xe   :  { %278 = vmatprep.subr.bf16.mxu0 %v624_v9  ;;  %v146_v43 = vpack.c.bf16 %v139_v39, %v136_v36  ;;  %v142_v51 = vpack.c.bf16 %v123_v45, %v125_v47  ;;  %v141_v56 = vsel %vm753_vm5, 0.0, %v137_v50  ;;  %v121_v58 = vsel %vm120_vm3, %v118_v53, %v119_v38 }
   0xf   :  { %152 = vrot.lane.b32.xlu0 %v145_v27, %s625_s12  ;;  %v122_v59 = vsel %vm120_vm3, %v117_v28, %v118_v53  ;;  %v147_v60 = vpack.c.bf16 %v141_v56, %v134_v49 }
  0x10   :  { %555 = vmatprep.mubr.msk.bf16.mxu0 %vm154_vm2, %v146_v43  ;;  %v127_v63 = vsel %vm764_vm6, 0.0, %v122_v59 }
  0x11   :  { %279 = vmatpush1.bf16.msra.mxu0 %v579_v29  ;;  %v143_v2 = vpack.c.bf16 %v121_v58, %v127_v63 }
  0x12   :  { %280 = vmatprep.subr.bf16.mxu0 %v624_v9 }
  0x15   :  { %281 = vmatpush1.bf16.msra.mxu0 %v580_v42 }
  0x16   :  { %282 = vmatprep.subr.bf16.mxu0 %v624_v9 }
  0x19   :  { %283 = vmatpush1.bf16.msra.mxu0 %v581_v54 }
  0x1a   :  { %284 = vmatprep.subr.bf16.mxu0 %v624_v9 }
  0x1b   :  { %11 = vsyncpa [#allocation3], 0  ;;  %v583_v3 = vld [vmem:[%s898_s1 + $0x38] sm:$0xff]   ;;  %v584_v4 = vld [vmem:[%s898_s1 + $0x40] sm:$0xff]  }
  0x1c   :  { %v585_v5 = vld [vmem:[%s898_s1 + $0x48] sm:$0xff]   ;;  %v586_v6 = vld [vmem:[%s898_s1 + $0x50] sm:$0xff]   ;;  %v587_v10 = vld [vmem:[%s898_s1 + $0x58] sm:$0xff]  }
  0x1d   :  { %285 = vmatpush1.bf16.msra.mxu0 %v582_v62  ;;  %v588_v16 = vld [vmem:[%s899_s2] sm:$0xff]   ;;  %v589_v17 = vld [vmem:[%s899_s2 + $0x8] sm:$0xff]   ;;  %v590_v18 = vld [vmem:[%s899_s2 + $0x10] sm:$0xff]  }
  0x1e   :  { %286 = vmatprep.subr.bf16.mxu0 %v624_v9  ;;  %472 = vmatpush1.bf16.msra.mxu1 %v588_v16  ;;  %v591_v19 = vld [vmem:[%s899_s2 + $0x18] sm:$0xff]   ;;  %v592_v20 = vld [vmem:[%s899_s2 + $0x20] sm:$0xff]   ;;  %v593_v21 = vld [vmem:[%s899_s2 + $0x28] sm:$0xff]  }
  0x1f   :  { %473 = vmatprep.subr.bf16.mxu1 %v624_v9  ;;  %v594_v22 = vld [vmem:[%s899_s2 + $0x30] sm:$0xff]   ;;  %v595_v23 = vld [vmem:[%s899_s2 + $0x38] sm:$0xff]   ;;  %v596_v24 = vld [vmem:[%s899_s2 + $0x40] sm:$0xff]  }
  0x20   :  { %v597_v25 = vld [vmem:[%s899_s2 + $0x48] sm:$0xff]   ;;  %v598_v26 = vld [vmem:[%s899_s2 + $0x50] sm:$0xff]   ;;  %v599_v27 = vld [vmem:[%s899_s2 + $0x58] sm:$0xff]   ;;  %s626_s2 = smov [#allocation2]  }
  0x21   :  { %287 = vmatpush1.bf16.msra.mxu0 %v583_v3  ;;  %v542_v28 = vld [vmem:[%s902_s5] ss:$0 sm:$0xff]  ;;  %s529_s5 = sshll.u32 %s626_s2, 4  ;;  %s530_s5 = int_to_ptr.vmem [resolvable:$true] %s529_s5 }
  0x22   :  { %288 = vmatprep.subr.bf16.mxu0 %v624_v9  ;;  %474 = vmatpush1.bf16.msra.mxu1 %v589_v17  ;;  %p605_p1 = scmp.lt.s32.totalorder %s530_s5, %s530_s5 }
  0x23   :  { %475 = vmatprep.subr.bf16.mxu1 %v624_v9 }
  0x25   :  { %289 = vmatpush1.bf16.msra.mxu0 %v584_v4 }
  0x26   :  { %290 = vmatprep.subr.bf16.mxu0 %v624_v9  ;;  %476 = vmatpush1.bf16.msra.mxu1 %v590_v18 }
  0x27   :  { %477 = vmatprep.subr.bf16.mxu1 %v624_v9 }
  0x29   :  { %291 = vmatpush1.bf16.msra.mxu0 %v585_v5 }
  0x2a   :  { %292 = vmatprep.subr.bf16.mxu0 %v624_v9  ;;  %478 = vmatpush1.bf16.msra.mxu1 %v591_v19 }
  0x2b   :  { %479 = vmatprep.subr.bf16.mxu1 %v624_v9 }
  0x2d   :  { %293 = vmatpush1.bf16.msra.mxu0 %v586_v6 }
  0x2e   :  { %294 = vmatprep.subr.bf16.mxu0 %v624_v9  ;;  %480 = vmatpush1.bf16.msra.mxu1 %v592_v20 }
  0x2f   :  { %481 = vmatprep.subr.bf16.mxu1 %v624_v9 }
  0x31   :  { %295 = vmatpush1.bf16.msra.mxu0 %v587_v10 }
  0x32   :  { %482 = vmatpush1.bf16.msra.mxu1 %v593_v21 }
  0x33   :  { %483 = vmatprep.subr.bf16.mxu1 %v624_v9 }
  0x36   :  { %484 = vmatpush1.bf16.msra.mxu1 %v594_v22 }
  0x37   :  { %485 = vmatprep.subr.bf16.mxu1 %v624_v9 }
  0x3a   :  { %486 = vmatpush1.bf16.msra.mxu1 %v595_v23 }
  0x3b   :  { %487 = vmatprep.subr.bf16.mxu1 %v624_v9 }
  0x3e   :  { %488 = vmatpush1.bf16.msra.mxu1 %v596_v24 }
  0x3f   :  { %489 = vmatprep.subr.bf16.mxu1 %v624_v9 }
  0x42   :  { %490 = vmatpush1.bf16.msra.mxu1 %v597_v25 }
  0x43   :  { %491 = vmatprep.subr.bf16.mxu1 %v624_v9 }
  0x46   :  { %492 = vmatpush1.bf16.msra.mxu1 %v598_v26 }
  0x47   :  { %493 = vmatprep.subr.bf16.mxu1 %v624_v9 }
  0x4a   :  { %494 = vmatpush1.bf16.msra.mxu1 %v599_v27 }
  0x7d   :  { %v151_v11 = vpop.permute.xlu0 %150 }
  0x7e   :  { %v157_v12 = vsel %vm154_vm2, %v142_v51, %v151_v11 }
  0x7f   :  { %305 = vmatmul.mubr.bf16.vlgmr.msra.gmra.mrb[0].mxu0 %v157_v12 }
  0x80   :  { %556 = vmatprep.mubr.msk.bf16.mxu0 %vm154_vm2, %v147_v60 }
  0x81   :  { %v153_v14 = vpop.permute.xlu0 %152 }
  0x82   :  { %v161_v15 = vsel %vm154_vm2, %v143_v2, %v153_v14 }
  0x87   :  { %313 = vmatmul.mubr.bf16.gmra.mrb[4].mxu0 %v161_v15 }
 0x152   :  { %v306_v29 = vpop.f32.mrb[0].mxu0 }
 0x153   :  { %v307_v30 = vadd.f32 %v542_v28, %v306_v29  ;;  %v308_v31 = vpop.f32.mrb[1].mxu0 }
 0x154   :  { %v309_v32 = vpop.f32.mrb[2].mxu0 }
 0x155   :  { %v321_v34 = vmax.f32 %v307_v30, 0.0  ;;  %v310_v35 = vadd.f32 %v542_v28, %v309_v32  ;;  %v311_v36 = vpop.f32.mrb[3].mxu0 }
 0x157   :  { %v322_v37 = vmax.f32 %v310_v35, 0.0  ;;  %v325_v38 = vrot.slane %v321_v34, 7  ;;  %v337_v39 = vrot.slane %v321_v34, 1 }
 0x159   :  { %v326_v40 = vrot.slane %v322_v37, 7  ;;  %v338_v41 = vrot.slane %v322_v37, 1  ;;  %v351_v42 = vpack.c.bf16 %v322_v37, %v321_v34 }
 0x15a   :  { %v314_v43 = vpop.f32.mrb[4].mxu0 }
 0x15b   :  { %v315_v9 = vadd.f32 %v542_v28, %v314_v43  ;;  %v316_v45 = vpop.f32.mrb[5].mxu0  ;;  %357 = vrot.lane.b32.xlu1 %v351_v42, %s625_s12  ;;  %v343_v46 = vsel %vm133_vm1, %v337_v39, %v338_v41  ;;  %v331_v47 = vsel %vm120_vm3, %v325_v38, %v326_v40 }
 0x15c   :  { %v317_v48 = vpop.f32.mrb[6].mxu0 }
 0x15d   :  { %v323_v49 = vmax.f32 %v315_v9, 0.0  ;;  %v318_v50 = vadd.f32 %v542_v28, %v317_v48  ;;  %v319_v51 = vpop.f32.mrb[7].mxu0 }
 0x15f   :  { %v327_v52 = vrot.slane %v323_v49, 7  ;;  %v339_v53 = vrot.slane %v323_v49, 1  ;;  %v324_v54 = vmax.f32 %v318_v50, 0.0 }
 0x161   :  { %v328_v56 = vrot.slane %v324_v54, 7  ;;  %v340_v57 = vrot.slane %v324_v54, 1  ;;  %v352_v58 = vpack.c.bf16 %v324_v54, %v323_v49  ;;  %v342_v59 = vsel %vm133_vm1, %v338_v41, %v339_v53 }
 0x162   :  { %v346_v60 = vsel %vm714_vm0, 0.0, %v342_v59  ;;  %v330_v62 = vsel %vm120_vm3, %v326_v40, %v327_v52 }
 0x163   :  { %359 = vrot.lane.b32.xlu1 %v352_v58, %s625_s12  ;;  %v353_v63 = vpack.c.bf16 %v346_v60, %v343_v46  ;;  %v332_v2 = vsel %vm120_vm3, %v328_v56, %v325_v38  ;;  %v341_v3 = vsel %vm133_vm1, %v339_v53, %v340_v57  ;;  %v344_v4 = vsel %vm133_vm1, %v340_v57, %v337_v39  ;;  %s600_s12 = scalar_lea.vmem %s530_s5, 512 }
 0x164   :  { %v333_v5 = vsel %vm733_vm4, 0.0, %v332_v2  ;;  %v348_v33 = vsel %vm753_vm5, 0.0, %v344_v4  ;;  %v329_v6 = vsel %vm120_vm3, %v327_v52, %v328_v56  ;;  %v335_v10 = vsel %vm764_vm6, 0.0, %v330_v62  ;;  %p601_p0 = scmp.ne.s32.totalorder %s530_s5, %s600_s12  ;;  %p606_p2 = scmp.lt.s32.totalorder %s600_s12, %s600_s12 }
 0x165   :  { %569 = vmatprep.mubr.msk.bf16.mxu1 %vm154_vm2, %v353_v63  ;;  %v349_v11 = vpack.c.bf16 %v331_v47, %v333_v5  ;;  %v354_v12 = vpack.c.bf16 %v348_v33, %v341_v3  ;;  %v350_v14 = vpack.c.bf16 %v329_v6, %v335_v10 }
 0x166   :  { %p607_p3 = por %p606_p2, %p605_p1 }
 0x168   :  { %p608_p4 = pnand %p607_p3, %p601_p0 }
 0x1cd   :  { %v358_v15 = vpop.permute.xlu1 %357 }
 0x1ce   :  { %v363_v16 = vsel %vm154_vm2, %v349_v11, %v358_v15 }
 0x1cf   :  { %504 = vmatmul.mubr.bf16.vlgmr.msra.gmra.mrb[0].mxu1 %v363_v16 }
 0x1d0   :  { %570 = vmatprep.mubr.msk.bf16.mxu1 %vm154_vm2, %v354_v12 }
 0x1d5   :  { %v360_v44 = vpop.permute.xlu1 %359 }
 0x1d6   :  { %v367_v55 = vsel %vm154_vm2, %v350_v14, %v360_v44 }
 0x1d7   :  { %512 = vmatmul.mubr.bf16.gmra.mrb[4].mxu1 %v367_v55 }
 0x2a2   :  { %v505_v13 = vpop.f32.mrb[0].mxu1 }
 0x2a3   :  { %v506_v17 = vadd.f32 %v505_v13, %v667_v0  ;;  %v507_v61 = vpop.f32.mrb[1].mxu1 }
 0x2a4   :  { %v508_v18 = vpop.f32.mrb[2].mxu1 }
 0x2a5   :  { %520 = vst.msk [vmem:[#allocation2] sm:$0xff] %vm154_vm2, %v506_v17  ;;  %v509_v19 = vadd.f32 %v508_v18, %v672_v1  ;;  %v510_v20 = vpop.f32.mrb[3].mxu1 }
 0x2a7   :  { %521 = vst.msk [vmem:[#allocation2 + $0x8] sm:$0xff] %vm154_vm2, %v509_v19 }
 0x2aa   :  { %v513_v21 = vpop.f32.mrb[4].mxu1 }
 0x2ab   :  { %v514_v22 = vadd.f32 %v513_v21, %v685_v7  ;;  %v515_v23 = vpop.f32.mrb[5].mxu1 }
 0x2ac   :  { %v516_v24 = vpop.f32.mrb[6].mxu1 }
 0x2ad   :  { %522 = vst.msk [vmem:[#allocation2 + $0x10] sm:$0xff] %vm154_vm2, %v514_v22  ;;  %v517_v0 = vadd.f32 %v516_v24, %v690_v8  ;;  %v518_v25 = vpop.f32.mrb[7].mxu1 }
 0x2af   :  { %523 = vst.msk [vmem:[#allocation2 + $0x18] sm:$0xff] %vm154_vm2, %v517_v0 }
 0x2b0   :  { %611 = shalt.err (!%p608_p4)
}
 0x2b1   :  { %s612_s8 = scalar_lea.hbm %s903_s6, 512 }
 0x2b2   :  { %p613_p5 = scmp.ne.s32.totalorder %s903_s6, %s612_s8  ;;  %p616_p6 = scmp.lt.u32.totalorder %s612_s8, %s903_s6 }
 0x2b4   :  { %p618_p7 = pnand %p616_p6, %p613_p5 }
 0x2b6   :  { %621 = shalt.err (!%p618_p7)
}
 0x2b7   :  { %s627_s9 = smov 128   ;;  %s628_s10 = smov 8  }
 0x2b8   :  { %535 = dma.vmem_to_hbm [thread:$0]  %s530_s5, 512, %s903_s6, [#allocation3], %s627_s9, %s627_s9, %s628_s10  }
 0x2b9   :  { %622 = dma.done.wait [#allocation3], 512  }
 0x2ba   :  { %623 = vsyncadd [#allocation3], 4294966784 }
 0x2bb   :  { %539 = vsyncpa [#allocation3], 1 }

</bundles_post_ra>
